<compile_context>
chip_gen: v5e
topology: v5e:2x2
jax: 0.10.0
libtpu: 0.0.40
codegen_flags: <defaults>
</compile_context>

<pallas_src>
import jax
import jax.numpy as jnp
from jax.experimental import pallas as pl
from jax.experimental.pallas import tpu as pltpu

EPS = 1e-5  # nn.LayerNorm default eps


def _round_up(x, m):
    return ((x + m - 1) // m) * m


def _bf16_transcendentals_ok():
    """bf16 tanh helps on v6e/v7x (bf16 EUP/VPU); v5e and older have no bf16 path."""
    try:
        kind = jax.devices()[0].device_kind.lower()
    except Exception:
        return False
    return ("v6" in kind) or ("v7" in kind)


def _make_actor_kernel(use_bf16_tanh):
    tanh_dtype = jnp.bfloat16 if use_bf16_tanh else jnp.float32

    def _tanh(x):
        if use_bf16_tanh:
            return jnp.tanh(x.astype(tanh_dtype)).astype(jnp.float32)
        return jnp.tanh(x)

    def _layernorm_t(h, gamma, beta):
        # h: (H, TB), batch on lanes. Normalize over the hidden axis (axis 0).
        # One-pass statistics: var = E[x^2] - mean^2 (halves XLU reductions).
        inv_n = jnp.float32(1.0 / h.shape[0])
        mean = jnp.sum(h, axis=0, keepdims=True) * inv_n
        ex2 = jnp.sum(h * h, axis=0, keepdims=True) * inv_n
        inv = jax.lax.rsqrt(ex2 - mean * mean + EPS)
        return (h - mean) * (inv * gamma) + beta

    def kernel(obs_ref, goal_ref,
               w1o_ref, w1g_ref, b1_ref, g1_ref, be1_ref,
               w2_ref, b2_ref, g2_ref, be2_ref,
               w3_ref, b3_ref,
               w4_ref, b4_ref,
               mu_ref):
        # Layer 1 (concat fused): h1.T = W1.T @ [obs, goal].T + b1.
        # Both dot_generals contract the feature axis of each operand (the
        # q @ k.T pattern), so the result is already batch-on-lanes (H, TB)
        # without transposing obs/goal in HBM or in VMEM.
        dn = (((1,), (1,)), ((), ()))
        h = (jax.lax.dot_general(w1o_ref[...], obs_ref[...], dn,
                                 preferred_element_type=jnp.float32)
             + jax.lax.dot_general(w1g_ref[...], goal_ref[...], dn,
                                   preferred_element_type=jnp.float32)
             + b1_ref[...])
        h = _tanh(_layernorm_t(h, g1_ref[...], be1_ref[...]))

        # Layer 2: Linear -> LayerNorm -> Tanh   (lane-dense (H, TB))
        h = jnp.dot(w2_ref[...], h, preferred_element_type=jnp.float32) + b2_ref[...]
        h = _tanh(_layernorm_t(h, g2_ref[...], be2_ref[...]))

        # Layer 3: Linear -> ReLU
        h = jnp.dot(w3_ref[...], h, preferred_element_type=jnp.float32) + b3_ref[...]
        h = jnp.maximum(h, 0.0)

        # mu head: Linear -> tanh, stored as (A, TB) -> lane-dense stores.
        mu = jnp.dot(w4_ref[...], h, preferred_element_type=jnp.float32) + b4_ref[...]
        mu_ref[...] = _tanh(mu).astype(mu_ref.dtype)

    return kernel


def actor_forward(obs, goal, std, params, tile_b=4096, tanh_in_bf16=None):
    """Returns (mu, std) of the TruncatedNormal policy distribution."""
    obs = obs.astype(jnp.float32)
    goal = goal.astype(jnp.float32)
    B, obs_dim = obs.shape
    goal_dim = goal.shape[1]
    H = params["w2"].shape[0]
    A = params["w4"].shape[1]

    if tanh_in_bf16 is None:
        tanh_in_bf16 = _bf16_transcendentals_ok()

    # Transposed ("batch on lanes") weight layout -- tiny arrays, done once.
    w1oT = params["w1"][:obs_dim].T          # (H, obs_dim)
    w1gT = params["w1"][obs_dim:].T          # (H, goal_dim)
    w2T = params["w2"].T                     # (H, H)
    w3T = params["w3"].T                     # (H, H)
    w4T = params["w4"].T                     # (A, H)
    b1c = params["b1"].reshape(-1, 1)
    g1c = params["g1"].reshape(-1, 1)
    be1c = params["be1"].reshape(-1, 1)
    b2c = params["b2"].reshape(-1, 1)
    g2c = params["g2"].reshape(-1, 1)
    be2c = params["be2"].reshape(-1, 1)
    b3c = params["b3"].reshape(-1, 1)
    b4c = params["b4"].reshape(-1, 1)

    # Batch tile: batch lives on the lane axis inside the kernel, so align to
    # 128.  Large tiles amortize the ~0.35 us per-grid-step overhead.  No
    # jnp.pad: Pallas masks the ragged last block; garbage lanes stay confined
    # to their own batch column and are never observable in columns [0, B).
    TB = max(128, min(int(tile_b), _round_up(B, 128)))
    if pl.cdiv(B, TB) < 2 and B > 256:
        # >= 2 grid steps so dimension_semantics=("parallel",) can split the
        # batch across v7x's two TensorCores (and gives the pipeline overlap).
        TB = _round_up(pl.cdiv(B, 2), 128)
    grid = (pl.cdiv(B, TB),)

    # Rough double-buffered footprint; only set an explicit VMEM budget if
    # someone scales TB far beyond the default (v7x has 64 MiB physical VMEM).
    tile_bytes = 4 * TB * (2 * (obs_dim + goal_dim + A) + 8 * H)
    vmem_limit = None
    if tile_bytes > 24 * 1024 * 1024:
        vmem_limit = min(2 * tile_bytes, 100 * 1024 * 1024)

    weights = (w1oT, w1gT, b1c, g1c, be1c,
               w2T, b2c, g2c, be2c,
               w3T, b3c,
               w4T, b4c)

    def batch_spec(d):
        return pl.BlockSpec((TB, d), lambda i: (i, 0))

    def const_spec(t):
        # Full-array block, constant index -> stays VMEM-resident across steps.
        return pl.BlockSpec(t.shape, lambda i: (0,) * t.ndim)

    muT = pl.pallas_call(
        _make_actor_kernel(tanh_in_bf16),
        out_shape=jax.ShapeDtypeStruct((A, B), jnp.float32),
        grid_spec=pltpu.PrefetchScalarGridSpec(
            num_scalar_prefetch=0,
            grid=grid,
            in_specs=[batch_spec(obs_dim), batch_spec(goal_dim)]
                     + [const_spec(t) for t in weights],
            out_specs=pl.BlockSpec((A, TB), lambda i: (0, i)),
        ),
        compiler_params=pltpu.CompilerParams(
            dimension_semantics=("parallel",),
            vmem_limit_bytes=vmem_limit),
    )(obs, goal, *weights)

    mu = muT.T                                   # (B, A); tiny (A = 8 lanes)
    # std is a broadcast constant -> build in the wrapper instead of paying a
    # (B, A) HBM writeback of a constant from inside the kernel.
    std_out = jnp.full((B, A), jnp.float32(std), dtype=jnp.float32)
    return mu, std_out


def init_params(key, obs_dim, goal_dim, action_dim, hidden_dim):
    """Deterministic synthetic init (stand-in for utils.weight_init)."""
    din = obs_dim + goal_dim
    ks = jax.random.split(key, 8)
    s = lambda k, shape, fan_in: (jax.random.normal(k, shape, jnp.float32)
                                  / jnp.sqrt(jnp.float32(fan_in)))
    return {
        "w1": s(ks[0], (din, hidden_dim), din),
        "b1": jnp.zeros((1, hidden_dim), jnp.float32),
        "g1": jnp.ones((1, hidden_dim), jnp.float32),
        "be1": jnp.zeros((1, hidden_dim), jnp.float32),
        "w2": s(ks[1], (hidden_dim, hidden_dim), hidden_dim),
        "b2": jnp.zeros((1, hidden_dim), jnp.float32),
        "g2": jnp.ones((1, hidden_dim), jnp.float32),
        "be2": jnp.zeros((1, hidden_dim), jnp.float32),
        "w3": s(ks[2], (hidden_dim, hidden_dim), hidden_dim),
        "b3": jnp.zeros((1, hidden_dim), jnp.float32),
        "w4": s(ks[3], (hidden_dim, action_dim), hidden_dim),
        "b4": jnp.zeros((1, action_dim), jnp.float32),
    }


def _ref_layernorm(h, gamma, beta):
    mean = jnp.mean(h, axis=-1, keepdims=True)
    var = jnp.mean((h - mean) * (h - mean), axis=-1, keepdims=True)
    return (h - mean) * jax.lax.rsqrt(var + EPS) * gamma + beta


def ref_forward(obs, goal, std, p):
    x = jnp.concatenate([obs, goal], axis=-1)
    h = jnp.tanh(_ref_layernorm(x @ p["w1"] + p["b1"], p["g1"], p["be1"]))
    h = jnp.tanh(_ref_layernorm(h @ p["w2"] + p["b2"], p["g2"], p["be2"]))
    h = jnp.maximum(h @ p["w3"] + p["b3"], 0.0)
    mu = jnp.tanh(h @ p["w4"] + p["b4"])
    return mu, jnp.ones_like(mu) * std


if __name__ == "__main__":
    obs_dim, goal_dim, action_dim, hidden_dim = 24, 8, 8, 32
    batch = 8

    key = jax.random.PRNGKey(0)
    k_obs, k_goal, k_params = jax.random.split(key, 3)

    obs = jax.random.normal(k_obs, (batch, obs_dim), jnp.float32)
    goal = jax.random.normal(k_goal, (batch, goal_dim), jnp.float32)
    params = init_params(k_params, obs_dim, goal_dim, action_dim, hidden_dim)
    std = 0.2

    mu_ref_, std_ref_ = ref_forward(obs, goal, std, params)

    # Exact path (f32 transcendentals on every generation): tight tolerance.
    mu32, std32 = actor_forward(obs, goal, std, params, tanh_in_bf16=False)
    jax.block_until_ready((mu32, std32))
    assert mu32.shape == (batch, action_dim)
    assert std32.shape == (batch, action_dim)
    assert bool(jnp.allclose(std32, std_ref_))
    assert bool(jnp.allclose(mu32, mu_ref_, atol=1e-5, rtol=1e-5))

    # Device-default path (bf16 tanh on v6e/v7x): loose tolerance.
    mu, std_out = actor_forward(obs, goal, std, params)
    jax.block_until_ready((mu, std_out))
    assert mu.shape == (batch, action_dim)
    assert bool(jnp.all(jnp.abs(mu) <= 1.0))
    assert bool(jnp.allclose(mu, mu_ref_, atol=3e-2, rtol=3e-2))
    assert bool(jnp.allclose(std_out, std_ref_))

    print("KERNEL_OK")
</pallas_src>

<mosaic_0001>
module attributes {stable_mosaic.version = 11 : i64} {
  func.func @kernel(%arg0: i32, %arg1: memref<128x24xf32, #tpu.memory_space<vmem>>, %arg2: memref<128x8xf32, #tpu.memory_space<vmem>>, %arg3: memref<32x24xf32, #tpu.memory_space<vmem>>, %arg4: memref<32x8xf32, #tpu.memory_space<vmem>>, %arg5: memref<32x1xf32, #tpu.memory_space<vmem>>, %arg6: memref<32x1xf32, #tpu.memory_space<vmem>>, %arg7: memref<32x1xf32, #tpu.memory_space<vmem>>, %arg8: memref<32x32xf32, #tpu.memory_space<vmem>>, %arg9: memref<32x1xf32, #tpu.memory_space<vmem>>, %arg10: memref<32x1xf32, #tpu.memory_space<vmem>>, %arg11: memref<32x1xf32, #tpu.memory_space<vmem>>, %arg12: memref<32x32xf32, #tpu.memory_space<vmem>>, %arg13: memref<32x1xf32, #tpu.memory_space<vmem>>, %arg14: memref<8x32xf32, #tpu.memory_space<vmem>>, %arg15: memref<8x1xf32, #tpu.memory_space<vmem>>, %arg16: memref<8x128xf32, #tpu.memory_space<vmem>>) attributes {dimension_semantics = [#tpu.dimension_semantics<parallel>], iteration_bounds = array<i64: 1>, scalar_prefetch = 0 : i64, scratch_operands = 0 : i64, tpu.core_type = #tpu.core_type<tc>, window_params = [{transform_indices = @transform_0, window_bounds = array<i64: 128, 24>}, {transform_indices = @transform_1, window_bounds = array<i64: 128, 8>}, {pipeline_mode = #tpu.pipeline_mode<synchronous>, transform_indices = @transform_2, window_bounds = array<i64: 32, 24>}, {pipeline_mode = #tpu.pipeline_mode<synchronous>, transform_indices = @transform_3, window_bounds = array<i64: 32, 8>}, {pipeline_mode = #tpu.pipeline_mode<synchronous>, transform_indices = @transform_4, window_bounds = array<i64: 32, 1>}, {pipeline_mode = #tpu.pipeline_mode<synchronous>, transform_indices = @transform_5, window_bounds = array<i64: 32, 1>}, {pipeline_mode = #tpu.pipeline_mode<synchronous>, transform_indices = @transform_6, window_bounds = array<i64: 32, 1>}, {pipeline_mode = #tpu.pipeline_mode<synchronous>, transform_indices = @transform_7, window_bounds = array<i64: 32, 32>}, {pipeline_mode = #tpu.pipeline_mode<synchronous>, transform_indices = @transform_8, window_bounds = array<i64: 32, 1>}, {pipeline_mode = #tpu.pipeline_mode<synchronous>, transform_indices = @transform_9, window_bounds = array<i64: 32, 1>}, {pipeline_mode = #tpu.pipeline_mode<synchronous>, transform_indices = @transform_10, window_bounds = array<i64: 32, 1>}, {pipeline_mode = #tpu.pipeline_mode<synchronous>, transform_indices = @transform_11, window_bounds = array<i64: 32, 32>}, {pipeline_mode = #tpu.pipeline_mode<synchronous>, transform_indices = @transform_12, window_bounds = array<i64: 32, 1>}, {pipeline_mode = #tpu.pipeline_mode<synchronous>, transform_indices = @transform_13, window_bounds = array<i64: 8, 32>}, {pipeline_mode = #tpu.pipeline_mode<synchronous>, transform_indices = @transform_14, window_bounds = array<i64: 8, 1>}, {transform_indices = @transform_15, window_bounds = array<i64: 8, 128>}]} {
    %c0 = arith.constant 0 : index
    %c0_0 = arith.constant 0 : index
    %0 = vector.load %arg3[%c0, %c0_0] : memref<32x24xf32, #tpu.memory_space<vmem>>, vector<32x24xf32>
    %c0_1 = arith.constant 0 : index
    %c0_2 = arith.constant 0 : index
    %1 = vector.load %arg1[%c0_1, %c0_2] : memref<128x24xf32, #tpu.memory_space<vmem>>, vector<128x24xf32>
    %cst = arith.constant dense<0.000000e+00> : vector<32x128xf32>
    %2 = tpu.matmul %0, %1, %cst {dimension_numbers = #tpu.dot_dimension_numbers<[1], [1], [0], [0], [0, 0, 1, 0], [], []>} : vector<32x24xf32>, vector<128x24xf32>, vector<32x128xf32> -> vector<32x128xf32>
    %c0_3 = arith.constant 0 : index
    %c0_4 = arith.constant 0 : index
    %3 = vector.load %arg4[%c0_3, %c0_4] : memref<32x8xf32, #tpu.memory_space<vmem>>, vector<32x8xf32>
    %c0_5 = arith.constant 0 : index
    %c0_6 = arith.constant 0 : index
    %4 = vector.load %arg2[%c0_5, %c0_6] : memref<128x8xf32, #tpu.memory_space<vmem>>, vector<128x8xf32>
    %cst_7 = arith.constant dense<0.000000e+00> : vector<32x128xf32>
    %5 = tpu.matmul %3, %4, %cst_7 {dimension_numbers = #tpu.dot_dimension_numbers<[1], [1], [0], [0], [0, 0, 1, 0], [], []>} : vector<32x8xf32>, vector<128x8xf32>, vector<32x128xf32> -> vector<32x128xf32>
    %6 = arith.addf %2, %5 : vector<32x128xf32>
    %c0_8 = arith.constant 0 : index
    %c0_9 = arith.constant 0 : index
    %7 = vector.load %arg5[%c0_8, %c0_9] : memref<32x1xf32, #tpu.memory_space<vmem>>, vector<32x1xf32>
    %8 = vector.broadcast %7 : vector<32x1xf32> to vector<32x128xf32>
    %9 = arith.addf %6, %8 : vector<32x128xf32>
    %c0_10 = arith.constant 0 : index
    %c0_11 = arith.constant 0 : index
    %10 = vector.load %arg6[%c0_10, %c0_11] : memref<32x1xf32, #tpu.memory_space<vmem>>, vector<32x1xf32>
    %c0_12 = arith.constant 0 : index
    %c0_13 = arith.constant 0 : index
    %11 = vector.load %arg7[%c0_12, %c0_13] : memref<32x1xf32, #tpu.memory_space<vmem>>, vector<32x1xf32>
    %cst_14 = arith.constant dense<0.000000e+00> : vector<128xf32>
    %12 = vector.multi_reduction <add>, %9, %cst_14 [0] : vector<32x128xf32> to vector<128xf32>
    %13 = vector.shape_cast %12 : vector<128xf32> to vector<1x128xf32>
    %cst_15 = arith.constant 3.125000e-02 : f32
    %14 = vector.broadcast %cst_15 : f32 to vector<1x128xf32>
    %15 = arith.mulf %13, %14 : vector<1x128xf32>
    %16 = arith.mulf %9, %9 : vector<32x128xf32>
    %cst_16 = arith.constant dense<0.000000e+00> : vector<128xf32>
    %17 = vector.multi_reduction <add>, %16, %cst_16 [0] : vector<32x128xf32> to vector<128xf32>
    %18 = vector.shape_cast %17 : vector<128xf32> to vector<1x128xf32>
    %cst_17 = arith.constant 3.125000e-02 : f32
    %19 = vector.broadcast %cst_17 : f32 to vector<1x128xf32>
    %20 = arith.mulf %18, %19 : vector<1x128xf32>
    %21 = arith.mulf %15, %15 : vector<1x128xf32>
    %22 = arith.subf %20, %21 : vector<1x128xf32>
    %cst_18 = arith.constant 9.99999974E-6 : f32
    %23 = vector.broadcast %cst_18 : f32 to vector<1x128xf32>
    %24 = arith.addf %22, %23 : vector<1x128xf32>
    %25 = math.rsqrt %24 : vector<1x128xf32>
    %26 = vector.broadcast %15 : vector<1x128xf32> to vector<32x128xf32>
    %27 = arith.subf %9, %26 : vector<32x128xf32>
    %28 = vector.broadcast %25 : vector<1x128xf32> to vector<32x128xf32>
    %29 = vector.broadcast %10 : vector<32x1xf32> to vector<32x128xf32>
    %30 = arith.mulf %28, %29 : vector<32x128xf32>
    %31 = arith.mulf %27, %30 : vector<32x128xf32>
    %32 = vector.broadcast %11 : vector<32x1xf32> to vector<32x128xf32>
    %33 = arith.addf %31, %32 : vector<32x128xf32>
    %34 = math.tanh %33 : vector<32x128xf32>
    %c0_19 = arith.constant 0 : index
    %c0_20 = arith.constant 0 : index
    %35 = vector.load %arg8[%c0_19, %c0_20] : memref<32x32xf32, #tpu.memory_space<vmem>>, vector<32x32xf32>
    %cst_21 = arith.constant dense<0.000000e+00> : vector<32x128xf32>
    %36 = tpu.matmul %35, %34, %cst_21 {dimension_numbers = #tpu.dot_dimension_numbers<[1], [0], [0], [1], [0, 0, 1, 1], [], []>} : vector<32x32xf32>, vector<32x128xf32>, vector<32x128xf32> -> vector<32x128xf32>
    %c0_22 = arith.constant 0 : index
    %c0_23 = arith.constant 0 : index
    %37 = vector.load %arg9[%c0_22, %c0_23] : memref<32x1xf32, #tpu.memory_space<vmem>>, vector<32x1xf32>
    %38 = vector.broadcast %37 : vector<32x1xf32> to vector<32x128xf32>
    %39 = arith.addf %36, %38 : vector<32x128xf32>
    %c0_24 = arith.constant 0 : index
    %c0_25 = arith.constant 0 : index
    %40 = vector.load %arg10[%c0_24, %c0_25] : memref<32x1xf32, #tpu.memory_space<vmem>>, vector<32x1xf32>
    %c0_26 = arith.constant 0 : index
    %c0_27 = arith.constant 0 : index
    %41 = vector.load %arg11[%c0_26, %c0_27] : memref<32x1xf32, #tpu.memory_space<vmem>>, vector<32x1xf32>
    %cst_28 = arith.constant dense<0.000000e+00> : vector<128xf32>
    %42 = vector.multi_reduction <add>, %39, %cst_28 [0] : vector<32x128xf32> to vector<128xf32>
    %43 = vector.shape_cast %42 : vector<128xf32> to vector<1x128xf32>
    %cst_29 = arith.constant 3.125000e-02 : f32
    %44 = vector.broadcast %cst_29 : f32 to vector<1x128xf32>
    %45 = arith.mulf %43, %44 : vector<1x128xf32>
    %46 = arith.mulf %39, %39 : vector<32x128xf32>
    %cst_30 = arith.constant dense<0.000000e+00> : vector<128xf32>
    %47 = vector.multi_reduction <add>, %46, %cst_30 [0] : vector<32x128xf32> to vector<128xf32>
    %48 = vector.shape_cast %47 : vector<128xf32> to vector<1x128xf32>
    %cst_31 = arith.constant 3.125000e-02 : f32
    %49 = vector.broadcast %cst_31 : f32 to vector<1x128xf32>
    %50 = arith.mulf %48, %49 : vector<1x128xf32>
    %51 = arith.mulf %45, %45 : vector<1x128xf32>
    %52 = arith.subf %50, %51 : vector<1x128xf32>
    %cst_32 = arith.constant 9.99999974E-6 : f32
    %53 = vector.broadcast %cst_32 : f32 to vector<1x128xf32>
    %54 = arith.addf %52, %53 : vector<1x128xf32>
    %55 = math.rsqrt %54 : vector<1x128xf32>
    %56 = vector.broadcast %45 : vector<1x128xf32> to vector<32x128xf32>
    %57 = arith.subf %39, %56 : vector<32x128xf32>
    %58 = vector.broadcast %55 : vector<1x128xf32> to vector<32x128xf32>
    %59 = vector.broadcast %40 : vector<32x1xf32> to vector<32x128xf32>
    %60 = arith.mulf %58, %59 : vector<32x128xf32>
    %61 = arith.mulf %57, %60 : vector<32x128xf32>
    %62 = vector.broadcast %41 : vector<32x1xf32> to vector<32x128xf32>
    %63 = arith.addf %61, %62 : vector<32x128xf32>
    %64 = math.tanh %63 : vector<32x128xf32>
    %c0_33 = arith.constant 0 : index
    %c0_34 = arith.constant 0 : index
    %65 = vector.load %arg12[%c0_33, %c0_34] : memref<32x32xf32, #tpu.memory_space<vmem>>, vector<32x32xf32>
    %cst_35 = arith.constant dense<0.000000e+00> : vector<32x128xf32>
    %66 = tpu.matmul %65, %64, %cst_35 {dimension_numbers = #tpu.dot_dimension_numbers<[1], [0], [0], [1], [0, 0, 1, 1], [], []>} : vector<32x32xf32>, vector<32x128xf32>, vector<32x128xf32> -> vector<32x128xf32>
    %c0_36 = arith.constant 0 : index
    %c0_37 = arith.constant 0 : index
    %67 = vector.load %arg13[%c0_36, %c0_37] : memref<32x1xf32, #tpu.memory_space<vmem>>, vector<32x1xf32>
    %68 = vector.broadcast %67 : vector<32x1xf32> to vector<32x128xf32>
    %69 = arith.addf %66, %68 : vector<32x128xf32>
    %cst_38 = arith.constant 0.000000e+00 : f32
    %70 = vector.broadcast %cst_38 : f32 to vector<32x128xf32>
    %71 = arith.maximumf %69, %70 : vector<32x128xf32>
    %c0_39 = arith.constant 0 : index
    %c0_40 = arith.constant 0 : index
    %72 = vector.load %arg14[%c0_39, %c0_40] : memref<8x32xf32, #tpu.memory_space<vmem>>, vector<8x32xf32>
    %cst_41 = arith.constant dense<0.000000e+00> : vector<8x128xf32>
    %73 = tpu.matmul %72, %71, %cst_41 {dimension_numbers = #tpu.dot_dimension_numbers<[1], [0], [0], [1], [0, 0, 1, 1], [], []>} : vector<8x32xf32>, vector<32x128xf32>, vector<8x128xf32> -> vector<8x128xf32>
    %c0_42 = arith.constant 0 : index
    %c0_43 = arith.constant 0 : index
    %74 = vector.load %arg15[%c0_42, %c0_43] : memref<8x1xf32, #tpu.memory_space<vmem>>, vector<8x1xf32>
    %75 = vector.broadcast %74 : vector<8x1xf32> to vector<8x128xf32>
    %76 = arith.addf %73, %75 : vector<8x128xf32>
    %77 = math.tanh %76 : vector<8x128xf32>
    %c0_44 = arith.constant 0 : index
    %c0_45 = arith.constant 0 : index
    %78 = vector.load %arg16[%c0_44, %c0_45] : memref<8x128xf32, #tpu.memory_space<vmem>>, vector<8x128xf32>
    tpu.vector_store %arg16[%c0_44, %c0_45], %77 {strides = array<i32>} : memref<8x128xf32, #tpu.memory_space<vmem>>, vector<8x128xf32>,
    return
  }
  func.func @transform_0(%arg0: i32) -> (i32, i32) {
    %c0_i32 = arith.constant 0 : i32
    %c0_i32_0 = arith.constant 0 : i32
    return %arg0, %c0_i32 : i32, i32
  }
  func.func @transform_1(%arg0: i32) -> (i32, i32) {
    %c0_i32 = arith.constant 0 : i32
    %c0_i32_0 = arith.constant 0 : i32
    return %arg0, %c0_i32 : i32, i32
  }
  func.func @transform_2(%arg0: i32) -> (i32, i32) {
    %c0_i32 = arith.constant 0 : i32
    %c0_i32_0 = arith.constant 0 : i32
    %c0_i32_1 = arith.constant 0 : i32
    return %c0_i32, %c0_i32_0 : i32, i32
  }
  func.func @transform_3(%arg0: i32) -> (i32, i32) {
    %c0_i32 = arith.constant 0 : i32
    %c0_i32_0 = arith.constant 0 : i32
    %c0_i32_1 = arith.constant 0 : i32
    return %c0_i32, %c0_i32_0 : i32, i32
  }
  func.func @transform_4(%arg0: i32) -> (i32, i32) {
    %c0_i32 = arith.constant 0 : i32
    %c0_i32_0 = arith.constant 0 : i32
    %c0_i32_1 = arith.constant 0 : i32
    return %c0_i32, %c0_i32_0 : i32, i32
  }
  func.func @transform_5(%arg0: i32) -> (i32, i32) {
    %c0_i32 = arith.constant 0 : i32
    %c0_i32_0 = arith.constant 0 : i32
    %c0_i32_1 = arith.constant 0 : i32
    return %c0_i32, %c0_i32_0 : i32, i32
  }
  func.func @transform_6(%arg0: i32) -> (i32, i32) {
    %c0_i32 = arith.constant 0 : i32
    %c0_i32_0 = arith.constant 0 : i32
    %c0_i32_1 = arith.constant 0 : i32
    return %c0_i32, %c0_i32_0 : i32, i32
  }
  func.func @transform_7(%arg0: i32) -> (i32, i32) {
    %c0_i32 = arith.constant 0 : i32
    %c0_i32_0 = arith.constant 0 : i32
    %c0_i32_1 = arith.constant 0 : i32
    return %c0_i32, %c0_i32_0 : i32, i32
  }
  func.func @transform_8(%arg0: i32) -> (i32, i32) {
    %c0_i32 = arith.constant 0 : i32
    %c0_i32_0 = arith.constant 0 : i32
    %c0_i32_1 = arith.constant 0 : i32
    return %c0_i32, %c0_i32_0 : i32, i32
  }
  func.func @transform_9(%arg0: i32) -> (i32, i32) {
    %c0_i32 = arith.constant 0 : i32
    %c0_i32_0 = arith.constant 0 : i32
    %c0_i32_1 = arith.constant 0 : i32
    return %c0_i32, %c0_i32_0 : i32, i32
  }
  func.func @transform_10(%arg0: i32) -> (i32, i32) {
    %c0_i32 = arith.constant 0 : i32
    %c0_i32_0 = arith.constant 0 : i32
    %c0_i32_1 = arith.constant 0 : i32
    return %c0_i32, %c0_i32_0 : i32, i32
  }
  func.func @transform_11(%arg0: i32) -> (i32, i32) {
    %c0_i32 = arith.constant 0 : i32
    %c0_i32_0 = arith.constant 0 : i32
    %c0_i32_1 = arith.constant 0 : i32
    return %c0_i32, %c0_i32_0 : i32, i32
  }
  func.func @transform_12(%arg0: i32) -> (i32, i32) {
    %c0_i32 = arith.constant 0 : i32
    %c0_i32_0 = arith.constant 0 : i32
    %c0_i32_1 = arith.constant 0 : i32
    return %c0_i32, %c0_i32_0 : i32, i32
  }
  func.func @transform_13(%arg0: i32) -> (i32, i32) {
    %c0_i32 = arith.constant 0 : i32
    %c0_i32_0 = arith.constant 0 : i32
    %c0_i32_1 = arith.constant 0 : i32
    return %c0_i32, %c0_i32_0 : i32, i32
  }
  func.func @transform_14(%arg0: i32) -> (i32, i32) {
    %c0_i32 = arith.constant 0 : i32
    %c0_i32_0 = arith.constant 0 : i32
    %c0_i32_1 = arith.constant 0 : i32
    return %c0_i32, %c0_i32_0 : i32, i32
  }
  func.func @transform_15(%arg0: i32) -> (i32, i32) {
    %c0_i32 = arith.constant 0 : i32
    %c0_i32_0 = arith.constant 0 : i32
    return %c0_i32, %arg0 : i32, i32
  }
}

</mosaic_0001>

<bundles_post_ra>
// kernel: tpu_custom_call.1
= control target key start
LH: loop header
LB: loop body
LE: loop exit
PB: predicated region body
PF: predicated region fallthrough
CT: control target
= control target key end

     0   :  { %vm91_vm0 = vcmask 64512   ;;  %vm181_vm1 = vcmask 195584   ;;  %v802_v4 = vmov 0   ;;  %s1182_s0 = inlined_call_operand.vmem [shape: f32[8,24], index: 0, kind: input, shape index: {}]   ;;  %s1183_s1 = inlined_call_operand.vmem [shape: f32[8,8], index: 1, kind: input, shape index: {}]   ;;  %s1184_s2 = inlined_call_operand.vmem [shape: f32[32,24], index: 2, kind: input, shape index: {}]   ;;  %s1185_s3 = inlined_call_operand.vmem [shape: f32[32,8], index: 3, kind: input, shape index: {}]   ;;  %s1186_s4 = inlined_call_operand.vmem [shape: f32[32,1], index: 4, kind: input, shape index: {}]   ;;  %s1187_s5 = inlined_call_operand.vmem [shape: f32[32,1], index: 5, kind: input, shape index: {}]   ;;  %s1188_s6 = inlined_call_operand.vmem [shape: f32[32,1], index: 6, kind: input, shape index: {}]   ;;  %s1189_s7 = inlined_call_operand.vmem [shape: f32[32,32], index: 7, kind: input, shape index: {}]   ;;  %s1190_s8 = inlined_call_operand.vmem [shape: f32[32,1], index: 8, kind: input, shape index: {}]   ;;  %s1191_s9 = inlined_call_operand.vmem [shape: f32[32,1], index: 9, kind: input, shape index: {}]   ;;  %s1192_s10 = inlined_call_operand.vmem [shape: f32[32,1], index: 10, kind: input, shape index: {}]   ;;  %s1193_s11 = inlined_call_operand.vmem [shape: f32[32,32], index: 11, kind: input, shape index: {}]   ;;  %s1194_s12 = inlined_call_operand.vmem [shape: f32[32,1], index: 12, kind: input, shape index: {}]   ;;  %s1195_s13 = inlined_call_operand.vmem [shape: f32[8,32], index: 13, kind: input, shape index: {}]   ;;  %s1196_s14 = inlined_call_operand.vmem [shape: f32[8,1], index: 14, kind: input, shape index: {}]   ;;  %s1197_s15 = inlined_call_operand.hbm [shape: f32[8,8], index: 15, kind: output, shape index: {}]  }
   0x1   :  { %v90_v0 = vld [vmem:[%s1183_s1 + $0x78] sm:$0xff]  ;;  %v89_v2 = vld [vmem:[%s1183_s1 + $0x70] sm:$0xff]  ;;  %751 = vset.pattern.permute.xlu0 %v802_v4  ;;  %v271_v5 = vld [vmem:[%s1186_s4] sm:$0xff]  ;;  %752 = vset.pattern.permute.xlu1 %v802_v4 }
   0x2   :  { %v70_v1 = vld [vmem:[%s1182_s0 + $0x78] sm:$0xff]  ;;  %700 = vmatpush.xpose.msk.msra.mxu0 %vm91_vm0, %v90_v0  ;;  %v69_v3 = vld [vmem:[%s1182_s0 + $0x70] sm:$0xff]  ;;  %277 = vperm.xlu0 %751, %v271_v5   ;;  %v88_v7 = vld [vmem:[%s1183_s1 + $0x68] sm:$0xff] }
   0x3   :  { %720 = vmatpush.xpose.msk.msra.mxu1 %vm181_vm1, %v70_v1  ;;  %v273_v6 = vld [vmem:[%s1186_s4 + $0x10] sm:$0xff]  ;;  %753 = vset.pattern.permute.xlu2 %v802_v4  ;;  %v68_v8 = vld [vmem:[%s1182_s0 + $0x68] sm:$0xff]  ;;  %v274_v10 = vld [vmem:[%s1186_s4 + $0x18] sm:$0xff] }
   0x4   :  { %287 = vperm.xlu1 %752, %v273_v6   ;;  %v272_v9 = vld [vmem:[%s1186_s4 + $0x8] sm:$0xff]  ;;  %v87_v11 = vld [vmem:[%s1183_s1 + $0x60] sm:$0xff] }
   0x5   :  { %v67_v12 = vld [vmem:[%s1182_s0 + $0x60] sm:$0xff] }
   0x6   :  { %701 = vmatpush.xpose.msk.msra.mxu0 %vm91_vm0, %v89_v2 }
   0x7   :  { %721 = vmatpush.xpose.msk.msra.mxu1 %vm181_vm1, %v69_v3 }
   0xa   :  { %702 = vmatpush.xpose.msk.msra.mxu0 %vm91_vm0, %v88_v7 }
   0xb   :  { %722 = vmatpush.xpose.msk.msra.mxu1 %vm181_vm1, %v68_v8 }
   0xc   :  { %20 = vsyncpa [#allocation3], 0  ;;  %282 = vperm.xlu0 %751, %v272_v9   ;;  %292 = vperm.xlu1 %752, %v274_v10   ;;  %v86_v13 = vld [vmem:[%s1183_s1 + $0x58] sm:$0xff]  ;;  %v300_v15 = vld [vmem:[%s1187_s5 + $0x8] sm:$0xff]  ;;  %vm432_vm5 = vcmask 261120   ;;  %s803_s28 = smov [#allocation2]  }
   0xd   :  { %v66_v14 = vld [vmem:[%s1182_s0 + $0x58] sm:$0xff]  ;;  %v85_v17 = vld [vmem:[%s1183_s1 + $0x50] sm:$0xff]  ;;  %v84_v19 = vld [vmem:[%s1183_s1 + $0x48] sm:$0xff]  ;;  %s689_s4 = sshll.u32 %s803_s28, 4  ;;  %s691_s30 = sshll.u32 %s1197_s15, 4  ;;  %s690_s4 = int_to_ptr.vmem [resolvable:$true] %s689_s4  ;;  %s692_s30 = int_to_ptr.hbm [resolvable:$true] %s691_s30 }
   0xe   :  { %703 = vmatpush.xpose.msk.msra.mxu0 %vm91_vm0, %v87_v11  ;;  %v306_v16 = vld [vmem:[%s1188_s6 + $0x18] sm:$0xff]  ;;  %v65_v18 = vld [vmem:[%s1182_s0 + $0x50] sm:$0xff]  ;;  %v64_v20 = vld [vmem:[%s1182_s0 + $0x48] sm:$0xff] }
   0xf   :  { %723 = vmatpush.xpose.msk.msra.mxu1 %vm181_vm1, %v67_v12  ;;  %v305_v21 = vld [vmem:[%s1188_s6 + $0x10] sm:$0xff]  ;;  %v304_v22 = vld [vmem:[%s1188_s6 + $0x8] sm:$0xff]  ;;  %v83_v23 = vld [vmem:[%s1183_s1 + $0x40] sm:$0xff] }
  0x10   :  { %v63_v24 = vld [vmem:[%s1182_s0 + $0x40] sm:$0xff]  ;;  %v82_v25 = vld [vmem:[%s1183_s1 + $0x38] sm:$0xff]  ;;  %v409_v28 = vld [vmem:[%s1190_s8 + $0x8] sm:$0xff] }
  0x11   :  { %v62_v26 = vld [vmem:[%s1182_s0 + $0x38] sm:$0xff]  ;;  %v408_v27 = vld [vmem:[%s1190_s8] sm:$0xff]  ;;  %v81_v29 = vld [vmem:[%s1183_s1 + $0x30] sm:$0xff] }
  0x12   :  { %704 = vmatpush.xpose.msk.msra.mxu0 %vm91_vm0, %v86_v13  ;;  %v61_v30 = vld [vmem:[%s1182_s0 + $0x30] sm:$0xff]  ;;  %v80_v31 = vld [vmem:[%s1183_s1 + $0x28] sm:$0xff]  ;;  %v411_v33 = vld [vmem:[%s1190_s8 + $0x18] sm:$0xff] }
  0x13   :  { %724 = vmatpush.xpose.msk.msra.mxu1 %vm181_vm1, %v66_v14  ;;  %v60_v32 = vld [vmem:[%s1182_s0 + $0x28] sm:$0xff]  ;;  %v477_v34 = vld [vmem:[%s1191_s9 + $0x18] sm:$0xff]  ;;  %v79_v35 = vld [vmem:[%s1183_s1 + $0x20] sm:$0xff] }
  0x14   :  { %355 = vperm.xlu0 %751, %v300_v15   ;;  %393 = vperm.xlu1 %752, %v306_v16   ;;  %v59_v36 = vld [vmem:[%s1182_s0 + $0x20] sm:$0xff]  ;;  %v78_v37 = vld [vmem:[%s1183_s1 + $0x18] sm:$0xff]  ;;  %v475_v39 = vld [vmem:[%s1191_s9 + $0x8] sm:$0xff] }
  0x15   :  { %v58_v38 = vld [vmem:[%s1182_s0 + $0x18] sm:$0xff]  ;;  %v77_v41 = vld [vmem:[%s1183_s1 + $0x10] sm:$0xff]  ;;  %v76_v43 = vld [vmem:[%s1183_s1 + $0x8] sm:$0xff] }
  0x16   :  { %705 = vmatpush.xpose.msk.msra.mxu0 %vm91_vm0, %v85_v17  ;;  %v481_v40 = vld [vmem:[%s1192_s10 + $0x18] sm:$0xff]  ;;  %v57_v42 = vld [vmem:[%s1182_s0 + $0x10] sm:$0xff]  ;;  %v56_v44 = vld [vmem:[%s1182_s0 + $0x8] sm:$0xff] }
  0x17   :  { %725 = vmatpush.xpose.msk.msra.mxu1 %vm181_vm1, %v65_v18  ;;  %v480_v45 = vld [vmem:[%s1192_s10 + $0x10] sm:$0xff]  ;;  %v302_v46 = vld [vmem:[%s1187_s5 + $0x18] sm:$0xff]  ;;  %v479_v47 = vld [vmem:[%s1192_s10 + $0x8] sm:$0xff] }
  0x18   :  { %v75_v48 = vld [vmem:[%s1183_s1] sm:$0xff]  ;;  %365 = vperm.xlu2 %753, %v302_v46   ;;  %v301_v52 = vld [vmem:[%s1187_s5 + $0x10] sm:$0xff]  ;;  %v586_v53 = vld [vmem:[%s1194_s12 + $0x18] sm:$0xff] }
  0x19   :  { %v55_v49 = vld [vmem:[%s1182_s0] sm:$0xff]  ;;  %v585_v54 = vld [vmem:[%s1194_s12 + $0x10] sm:$0xff]  ;;  %v72_v55 = vld [vmem:[%s1185_s3 + $0x8] sm:$0xff] }
  0x1a   :  { %706 = vmatpush.xpose.msk.msra.mxu0 %vm91_vm0, %v84_v19  ;;  %v71_v50 = vld [vmem:[%s1185_s3] sm:$0xff]  ;;  %v52_v56 = vld [vmem:[%s1184_s2 + $0x8] sm:$0xff]  ;;  %v73_v60 = vld [vmem:[%s1185_s3 + $0x10] sm:$0xff] }
  0x1b   :  { %726 = vmatpush.xpose.msk.msra.mxu1 %vm181_vm1, %v64_v20  ;;  %v51_v51 = vld [vmem:[%s1184_s2] sm:$0xff]  ;;  %v53_v61 = vld [vmem:[%s1184_s2 + $0x10] sm:$0xff]  ;;  %v74_v63 = vld [vmem:[%s1185_s3 + $0x18] sm:$0xff] }
  0x1c   :  { %388 = vperm.xlu0 %751, %v305_v21   ;;  %383 = vperm.xlu1 %752, %v304_v22   ;;  %v299_v57 = vld [vmem:[%s1187_s5] sm:$0xff]  ;;  %v54_v0 = vld [vmem:[%s1184_s2 + $0x18] sm:$0xff]  ;;  %v410_v1 = vld [vmem:[%s1190_s8 + $0x10] sm:$0xff] }
  0x1d   :  { %v583_v58 = vld [vmem:[%s1194_s12] sm:$0xff]  ;;  %v476_v2 = vld [vmem:[%s1191_s9 + $0x10] sm:$0xff]  ;;  %v584_v5 = vld [vmem:[%s1194_s12 + $0x8] sm:$0xff] }
  0x1e   :  { %707 = vmatpush.xpose.msk.msra.mxu0 %vm91_vm0, %v83_v23  ;;  %v653_v59 = vld [vmem:[%s1196_s14] sm:$0xff] }
  0x1f   :  { %727 = vmatpush.xpose.msk.msra.mxu1 %vm181_vm1, %v63_v24  ;;  %v303_v62 = vld [vmem:[%s1188_s6] sm:$0xff] }
  0x20   :  { %360 = vperm.xlu2 %753, %v301_v52   ;;  %v474_v3 = vld [vmem:[%s1191_s9] sm:$0xff] }
  0x21   :  { %v478_v4 = vld [vmem:[%s1192_s10] sm:$0xff] }
  0x22   :  { %708 = vmatpush.xpose.msk.msra.mxu0 %vm91_vm0, %v82_v25 }
  0x23   :  { %728 = vmatpush.xpose.msk.msra.mxu1 %vm181_vm1, %v62_v26 }
  0x24   :  { %414 = vperm.xlu0 %751, %v408_v27   ;;  %419 = vperm.xlu1 %752, %v409_v28  }
  0x26   :  { %709 = vmatpush.xpose.msk.msra.mxu0 %vm91_vm0, %v81_v29 }
  0x27   :  { %729 = vmatpush.xpose.msk.msra.mxu1 %vm181_vm1, %v61_v30 }
  0x28   :  { %350 = vperm.xlu2 %753, %v299_v57  }
  0x2a   :  { %710 = vmatpush.xpose.msk.msra.mxu0 %vm91_vm0, %v80_v31 }
  0x2b   :  { %730 = vmatpush.xpose.msk.msra.mxu1 %vm181_vm1, %v60_v32 }
  0x2c   :  { %429 = vperm.xlu0 %751, %v411_v33   ;;  %540 = vperm.xlu1 %752, %v477_v34  }
  0x2e   :  { %711 = vmatpush.xpose.msk.msra.mxu0 %vm91_vm0, %v79_v35 }
  0x2f   :  { %731 = vmatpush.xpose.msk.msra.mxu1 %vm181_vm1, %v59_v36 }
  0x30   :  { %378 = vperm.xlu2 %753, %v303_v62  }
  0x32   :  { %712 = vmatpush.xpose.msk.msra.mxu0 %vm91_vm0, %v78_v37 }
  0x33   :  { %732 = vmatpush.xpose.msk.msra.mxu1 %vm181_vm1, %v58_v38 }
  0x34   :  { %530 = vperm.xlu0 %751, %v475_v39   ;;  %568 = vperm.xlu1 %752, %v481_v40  }
  0x36   :  { %713 = vmatpush.xpose.msk.msra.mxu0 %vm91_vm0, %v77_v41 }
  0x37   :  { %733 = vmatpush.xpose.msk.msra.mxu1 %vm181_vm1, %v57_v42 }
  0x38   :  { %424 = vperm.xlu2 %753, %v410_v1  }
  0x3a   :  { %714 = vmatpush.xpose.msk.msra.mxu0 %vm91_vm0, %v76_v43 }
  0x3b   :  { %734 = vmatpush.xpose.msk.msra.mxu1 %vm181_vm1, %v56_v44 }
  0x3c   :  { %563 = vperm.xlu0 %751, %v480_v45   ;;  %558 = vperm.xlu1 %752, %v479_v47  }
  0x3e   :  { %715 = vmatpush.xpose.msk.msra.mxu0 %vm91_vm0, %v75_v48 }
  0x3f   :  { %735 = vmatpush.xpose.msk.msra.mxu1 %vm181_vm1, %v55_v49 }
  0x40   :  { %535 = vperm.xlu2 %753, %v476_v2  }
  0x41   :  { %716 = vmatmul.msk.f32.vlgmr.msra.gmra.mxu0 %vm91_vm0, %v71_v50 }
  0x42   :  { %736 = vmatmul.msk.f32.vlgmr.msra.gmra.mxu1 %vm181_vm1, %v51_v51 }
  0x44   :  { %604 = vperm.xlu0 %751, %v586_v53   ;;  %599 = vperm.xlu1 %752, %v585_v54  }
  0x48   :  { %525 = vperm.xlu2 %753, %v474_v3  }
  0x49   :  { %717 = vmatmul.msk.f32.gmra.mxu0 %vm91_vm0, %v72_v55 }
  0x4a   :  { %737 = vmatmul.msk.f32.gmra.mxu1 %vm181_vm1, %v52_v56 }
  0x4c   :  { %589 = vperm.xlu0 %751, %v583_v58   ;;  %656 = vperm.xlu1 %752, %v653_v59  }
  0x50   :  { %553 = vperm.xlu2 %753, %v478_v4  }
  0x51   :  { %718 = vmatmul.msk.f32.gmra.mxu0 %vm91_vm0, %v73_v60 }
  0x52   :  { %738 = vmatmul.msk.f32.gmra.mxu1 %vm181_vm1, %v53_v61 }
  0x58   :  { %594 = vperm.xlu2 %753, %v584_v5  }
  0x59   :  { %719 = vmatmul.msk.f32.gmra.mxu0 %vm91_vm0, %v74_v63 }
  0x5a   :  { %739 = vmatmul.msk.f32.gmra.mxu1 %vm181_vm1, %v54_v0 }
  0x72   :  { %v366_v51 = vpop.permute.xlu2 %365 }
  0x74   :  { %v278_v8 = vpop.permute.xlu0 %277 }
  0x76   :  { %v288_v11 = vpop.permute.xlu1 %287 }
  0x7a   :  { %v361_v54 = vpop.permute.xlu2 %360 }
  0x7e   :  { %v283_v17 = vpop.permute.xlu0 %282  ;;  %v293_v28 = vpop.permute.xlu1 %292 }
  0x82   :  { %v351_v62 = vpop.permute.xlu2 %350 }
  0x86   :  { %v356_v58 = vpop.permute.xlu0 %355  ;;  %v394_v60 = vpop.permute.xlu1 %393 }
  0xbe   :  { %v169_v6 = vpop.f32.mrf.mxu0 }
  0xbf   :  { %v259_v7 = vpop.f32.mrf.mxu1 }
  0xc0   :  { %v260_v15 = vadd.f32 %v259_v7, %v169_v6 }
  0xc2   :  { %v1131_v19 = vadd.f32 %v278_v8, %v260_v15 }
  0xc4   :  { %v317_v24 = vmul.f32 %v1131_v19, %v1131_v19 }
  0xc6   :  { %v172_v9 = vpop.f32.mrf.mxu0 }
  0xc7   :  { %v262_v10 = vpop.f32.mrf.mxu1 }
  0xc8   :  { %v263_v12 = vadd.f32 %v262_v10, %v172_v9 }
  0xca   :  { %v296_v18 = vadd.f32 %v283_v17, %v263_v12  ;;  %v389_v12 = vpop.permute.xlu0 %388 }
  0xcc   :  { %v318_v21 = vmul.f32 %v296_v18, %v296_v18  ;;  %v307_v25 = vadd.f32 %v296_v18, %v1131_v19 }
  0xce   :  { %v175_v13 = vpop.f32.mrf.mxu0  ;;  %v321_v29 = vadd.f32 %v318_v21, %v317_v24  ;;  %v379_v21 = vpop.permute.xlu2 %378 }
  0xcf   :  { %v265_v14 = vpop.f32.mrf.mxu1 }
  0xd0   :  { %v266_v16 = vadd.f32 %v265_v14, %v175_v13 }
  0xd2   :  { %v297_v20 = vadd.f32 %v288_v11, %v266_v16  ;;  %v384_v16 = vpop.permute.xlu1 %383 }
  0xd4   :  { %v319_v26 = vmul.f32 %v297_v20, %v297_v20  ;;  %v308_v30 = vadd.f32 %v307_v25, %v297_v20  ;;  %v405_v25 = vld [vmem:[%s1189_s7 + $0x8] sm:$0xff] }
  0xd6   :  { %v178_v22 = vpop.f32.mrf.mxu0  ;;  %v322_v32 = vadd.f32 %v321_v29, %v319_v26  ;;  %v406_v26 = vld [vmem:[%s1189_s7 + $0x10] sm:$0xff] }
  0xd7   :  { %v268_v23 = vpop.f32.mrf.mxu1 }
  0xd8   :  { %v269_v27 = vadd.f32 %v268_v23, %v178_v22 }
  0xda   :  { %v298_v31 = vadd.f32 %v293_v28, %v269_v27  ;;  %v407_v27 = vld [vmem:[%s1189_s7 + $0x18] sm:$0xff] }
  0xdc   :  { %v309_v33 = vadd.f32 %v308_v30, %v298_v31  ;;  %v320_v34 = vmul.f32 %v298_v31, %v298_v31  ;;  %v415_v30 = vpop.permute.xlu0 %414 }
  0xde   :  { %v310_v35 = vrot.slane %v309_v33, 4  ;;  %v323_v36 = vadd.f32 %v322_v32, %v320_v34  ;;  %v425_v34 = vpop.permute.xlu2 %424 }
  0xe0   :  { %v311_v37 = vadd.f32 %v310_v35, %v309_v33  ;;  %v324_v38 = vrot.slane %v323_v36, 4 }
  0xe2   :  { %v312_v39 = vrot.slane %v311_v37, 2  ;;  %v325_v40 = vadd.f32 %v324_v38, %v323_v36 }
  0xe4   :  { %v313_v41 = vadd.f32 %v312_v39, %v311_v37  ;;  %v326_v42 = vrot.slane %v325_v40, 2 }
  0xe6   :  { %v314_v43 = vrot.slane %v313_v41, 1  ;;  %v327_v44 = vadd.f32 %v326_v42, %v325_v40 }
  0xe8   :  { %v315_v45 = vadd.f32 %v314_v43, %v313_v41  ;;  %v328_v46 = vrot.slane %v327_v44, 1  ;;  %v430_v41 = vpop.permute.xlu0 %429 }
  0xea   :  { %v316_v47 = vmul.f32 0.03125, %v315_v45  ;;  %v329_v48 = vadd.f32 %v328_v46, %v327_v44 }
  0xec   :  { %v330_v49 = vmul.f32 0.03125, %v329_v48  ;;  %v331_v50 = vmul.f32 %v316_v47, %v316_v47  ;;  %v347_v1 = vsub.f32 %v298_v31, %v316_v47  ;;  %v346_v2 = vsub.f32 %v297_v20, %v316_v47  ;;  %v420_v31 = vpop.permute.xlu1 %419 }
  0xed   :  { %v345_v3 = vsub.f32 %v296_v18, %v316_v47  ;;  %v344_v11 = vsub.f32 %v1131_v19, %v316_v47  ;;  %v404_v19 = vld [vmem:[%s1189_s7] sm:$0xff] }
  0xee   :  { %v332_v52 = vsub.f32 %v330_v49, %v331_v50 }
  0xf0   :  { %v333_v53 = vadd.f32 1e-05, %v332_v52 }
  0xf2   :  { %754 = vrsqrt.f32 %v333_v53  ;;  %vm340_vm3 = vweird.f32 %v333_v53 }
  0xf8   :  { %v755_v55 = vpop.eup %754 }
  0xf9   :  { %v335_v56 = vmul.f32 %v755_v55, %v333_v53  ;;  %vm341_vm2 = vweird.f32 %v755_v55 }
  0xfa   :  { %vm342_vm4 = vmor %vm340_vm3, %vm341_vm2 }
  0xfb   :  { %v336_v57 = vmul.f32 %v755_v55, %v335_v56 }
  0xfd   :  { %v337_v59 = vmul.f32 0.5, %v336_v57 }
  0xff   :  { %v338_v61 = vsub.f32 1.5, %v337_v59 }
 0x101   :  { %v339_v63 = vmul.f32 %v755_v55, %v338_v61 }
 0x103   :  { %v343_v0 = vsel %vm342_vm4, %v755_v55, %v339_v63 }
 0x104   :  { %v371_v4 = vmul.f32 %v366_v51, %v343_v0  ;;  %v370_v5 = vmul.f32 %v361_v54, %v343_v0  ;;  %v369_v6 = vmul.f32 %v356_v58, %v343_v0  ;;  %v368_v7 = vmul.f32 %v351_v62, %v343_v0 }
 0x106   :  { %v375_v8 = vmul.f32 %v371_v4, %v347_v1  ;;  %v374_v9 = vmul.f32 %v370_v5, %v346_v2  ;;  %v373_v10 = vmul.f32 %v369_v6, %v345_v3  ;;  %v372_v15 = vmul.f32 %v368_v7, %v344_v11  ;;  %v541_v3 = vpop.permute.xlu1 %540  ;;  %v536_v4 = vpop.permute.xlu2 %535 }
 0x108   :  { %v399_v13 = vadd.f32 %v394_v60, %v375_v8  ;;  %v398_v14 = vadd.f32 %v389_v12, %v374_v9  ;;  %v397_v17 = vadd.f32 %v384_v16, %v373_v10  ;;  %v396_v20 = vadd.f32 %v379_v21, %v372_v15  ;;  %v531_v8 = vpop.permute.xlu0 %530 }
 0x10a   :  { %756 = vtanh.f32 %v399_v13 }
 0x10b   :  { %758 = vtanh.f32 %v398_v14 }
 0x10c   :  { %760 = vtanh.f32 %v397_v17 }
 0x10d   :  { %762 = vtanh.f32 %v396_v20 }
 0x10e   :  { %v569_v10 = vpop.permute.xlu1 %568  ;;  %v526_v12 = vpop.permute.xlu2 %525 }
 0x110   :  { %v757_v18 = vpop.eup %756 }
 0x111   :  { %457 = vmatpush.msra.mxu2 %v757_v18  ;;  %v759_v22 = vpop.eup %758 }
 0x112   :  { %v761_v23 = vpop.eup %760 }
 0x113   :  { %458 = vmatpush.msra.mxu2 %v759_v22  ;;  %v763_v24 = vpop.eup %762 }
 0x115   :  { %459 = vmatpush.msra.mxu2 %v761_v23 }
 0x117   :  { %460 = vmatpush.msra.mxu2 %v763_v24 }
 0x118   :  { %740 = vmatmul.msk.f32.vlgmr.msra.gmra.mxu2 %vm432_vm5, %v404_v19 }
 0x120   :  { %741 = vmatmul.msk.f32.gmra.mxu2 %vm432_vm5, %v405_v25 }
 0x128   :  { %742 = vmatmul.msk.f32.gmra.mxu2 %vm432_vm5, %v406_v26  ;;  %v564_v26 = vpop.permute.xlu0 %563 }
 0x130   :  { %743 = vmatmul.msk.f32.gmra.mxu2 %vm432_vm5, %v407_v27 }
 0x19b   :  { %v462_v28 = vpop.f32.mrf.mxu2 }
 0x19c   :  { %v1153_v35 = vadd.f32 %v462_v28, %v415_v30  ;;  %v559_v30 = vpop.permute.xlu1 %558 }
 0x19e   :  { %v492_v38 = vmul.f32 %v1153_v35, %v1153_v35 }
 0x1a3   :  { %v465_v29 = vpop.f32.mrf.mxu2 }
 0x1a4   :  { %v466_v33 = vadd.f32 %v465_v29, %v420_v31 }
 0x1a6   :  { %v493_v37 = vmul.f32 %v466_v33, %v466_v33  ;;  %v482_v39 = vadd.f32 %v466_v33, %v1153_v35 }
 0x1a8   :  { %v496_v43 = vadd.f32 %v493_v37, %v492_v38 }
 0x1ab   :  { %v468_v32 = vpop.f32.mrf.mxu2 }
 0x1ac   :  { %v469_v36 = vadd.f32 %v468_v32, %v425_v34  ;;  %v554_v32 = vpop.permute.xlu2 %553 }
 0x1ae   :  { %v494_v40 = vmul.f32 %v469_v36, %v469_v36  ;;  %v483_v44 = vadd.f32 %v482_v39, %v469_v36  ;;  %v580_v39 = vld [vmem:[%s1193_s11 + $0x8] sm:$0xff] }
 0x1b0   :  { %v497_v46 = vadd.f32 %v496_v43, %v494_v40  ;;  %v581_v40 = vld [vmem:[%s1193_s11 + $0x10] sm:$0xff] }
 0x1b3   :  { %v471_v42 = vpop.f32.mrf.mxu2 }
 0x1b4   :  { %v472_v45 = vadd.f32 %v471_v42, %v430_v41  ;;  %v582_v41 = vld [vmem:[%s1193_s11 + $0x18] sm:$0xff] }
 0x1b6   :  { %v484_v47 = vadd.f32 %v483_v44, %v472_v45  ;;  %v495_v48 = vmul.f32 %v472_v45, %v472_v45 }
 0x1b8   :  { %v485_v49 = vrot.slane %v484_v47, 4  ;;  %v498_v50 = vadd.f32 %v497_v46, %v495_v48  ;;  %v600_v46 = vpop.permute.xlu1 %599 }
 0x1ba   :  { %v486_v51 = vadd.f32 %v485_v49, %v484_v47  ;;  %v499_v52 = vrot.slane %v498_v50, 4 }
 0x1bc   :  { %v487_v53 = vrot.slane %v486_v51, 2  ;;  %v500_v54 = vadd.f32 %v499_v52, %v498_v50  ;;  %v595_v50 = vpop.permute.xlu2 %594 }
 0x1be   :  { %v488_v55 = vadd.f32 %v487_v53, %v486_v51  ;;  %v501_v56 = vrot.slane %v500_v54, 2 }
 0x1c0   :  { %v489_v57 = vrot.slane %v488_v55, 1  ;;  %v502_v58 = vadd.f32 %v501_v56, %v500_v54 }
 0x1c2   :  { %v490_v59 = vadd.f32 %v489_v57, %v488_v55  ;;  %v503_v60 = vrot.slane %v502_v58, 1 }
 0x1c4   :  { %v491_v61 = vmul.f32 0.03125, %v490_v59  ;;  %v504_v62 = vadd.f32 %v503_v60, %v502_v58  ;;  %v652_v58 = vld [vmem:[%s1195_s13] sm:$0xff]  ;;  %v657_v59 = vpop.permute.xlu1 %656 }
 0x1c6   :  { %v505_v63 = vmul.f32 0.03125, %v504_v62  ;;  %v506_v0 = vmul.f32 %v491_v61, %v491_v61  ;;  %v522_v14 = vsub.f32 %v472_v45, %v491_v61  ;;  %v521_v16 = vsub.f32 %v469_v36, %v491_v61  ;;  %v605_v45 = vpop.permute.xlu0 %604 }
 0x1c7   :  { %v520_v17 = vsub.f32 %v466_v33, %v491_v61  ;;  %v519_v25 = vsub.f32 %v1153_v35, %v491_v61  ;;  %v579_v35 = vld [vmem:[%s1193_s11] sm:$0xff] }
 0x1c8   :  { %v507_v1 = vsub.f32 %v505_v63, %v506_v0 }
 0x1ca   :  { %v508_v2 = vadd.f32 1e-05, %v507_v1 }
 0x1cc   :  { %764 = vrsqrt.f32 %v508_v2  ;;  %vm515_vm7 = vweird.f32 %v508_v2 }
 0x1ce   :  { %v590_v53 = vpop.permute.xlu0 %589 }
 0x1d2   :  { %v765_v5 = vpop.eup %764 }
 0x1d3   :  { %v510_v6 = vmul.f32 %v765_v5, %v508_v2  ;;  %vm516_vm6 = vweird.f32 %v765_v5 }
 0x1d4   :  { %vm517_vm8 = vmor %vm515_vm7, %vm516_vm6 }
 0x1d5   :  { %v511_v7 = vmul.f32 %v765_v5, %v510_v6 }
 0x1d7   :  { %v512_v9 = vmul.f32 0.5, %v511_v7 }
 0x1d9   :  { %v513_v11 = vsub.f32 1.5, %v512_v9 }
 0x1db   :  { %v514_v13 = vmul.f32 %v765_v5, %v513_v11 }
 0x1dd   :  { %v518_v15 = vsel %vm517_vm8, %v765_v5, %v514_v13 }
 0x1de   :  { %v546_v21 = vmul.f32 %v541_v3, %v518_v15  ;;  %v545_v20 = vmul.f32 %v536_v4, %v518_v15  ;;  %v544_v18 = vmul.f32 %v531_v8, %v518_v15  ;;  %v543_v22 = vmul.f32 %v526_v12, %v518_v15 }
 0x1e0   :  { %v550_v23 = vmul.f32 %v546_v21, %v522_v14  ;;  %v549_v19 = vmul.f32 %v545_v20, %v521_v16  ;;  %v548_v24 = vmul.f32 %v544_v18, %v520_v17  ;;  %v547_v29 = vmul.f32 %v543_v22, %v519_v25 }
 0x1e2   :  { %v574_v27 = vadd.f32 %v569_v10, %v550_v23  ;;  %v573_v28 = vadd.f32 %v564_v26, %v549_v19  ;;  %v572_v31 = vadd.f32 %v559_v30, %v548_v24  ;;  %v571_v34 = vadd.f32 %v554_v32, %v547_v29 }
 0x1e4   :  { %766 = vtanh.f32 %v574_v27 }
 0x1e5   :  { %768 = vtanh.f32 %v573_v28 }
 0x1e6   :  { %770 = vtanh.f32 %v572_v31 }
 0x1e7   :  { %772 = vtanh.f32 %v571_v34 }
 0x1ea   :  { %v767_v33 = vpop.eup %766 }
 0x1eb   :  { %631 = vmatpush.msra.mxu3 %v767_v33  ;;  %v769_v36 = vpop.eup %768 }
 0x1ec   :  { %v771_v37 = vpop.eup %770 }
 0x1ed   :  { %632 = vmatpush.msra.mxu3 %v769_v36  ;;  %v773_v38 = vpop.eup %772 }
 0x1ef   :  { %633 = vmatpush.msra.mxu3 %v771_v37 }
 0x1f1   :  { %634 = vmatpush.msra.mxu3 %v773_v38 }
 0x1f2   :  { %744 = vmatmul.msk.f32.vlgmr.msra.gmra.mxu3 %vm432_vm5, %v579_v35 }
 0x1fa   :  { %745 = vmatmul.msk.f32.gmra.mxu3 %vm432_vm5, %v580_v39 }
 0x202   :  { %746 = vmatmul.msk.f32.gmra.mxu3 %vm432_vm5, %v581_v40 }
 0x20a   :  { %747 = vmatmul.msk.f32.gmra.mxu3 %vm432_vm5, %v582_v41 }
 0x275   :  { %v636_v42 = vpop.f32.mrf.mxu3 }
 0x276   :  { %v637_v54 = vadd.f32 %v636_v42, %v590_v53 }
 0x278   :  { %v648_v57 = vmax.f32 %v637_v54, 0.0 }
 0x27d   :  { %v639_v43 = vpop.f32.mrf.mxu3 }
 0x27e   :  { %v640_v51 = vadd.f32 %v639_v43, %v595_v50 }
 0x280   :  { %v649_v56 = vmax.f32 %v640_v51, 0.0 }
 0x285   :  { %v642_v44 = vpop.f32.mrf.mxu3 }
 0x286   :  { %v643_v48 = vadd.f32 %v642_v44, %v600_v46 }
 0x288   :  { %v650_v55 = vmax.f32 %v643_v48, 0.0 }
 0x28d   :  { %v645_v47 = vpop.f32.mrf.mxu3 }
 0x28e   :  { %v646_v49 = vadd.f32 %v645_v47, %v605_v45 }
 0x290   :  { %v651_v52 = vmax.f32 %v646_v49, 0.0 }
 0x292   :  { %674 = vmatpush.msrb.mxu2 %v651_v52 }
 0x294   :  { %675 = vmatpush.msrb.mxu2 %v650_v55 }
 0x296   :  { %676 = vmatpush.msrb.mxu2 %v649_v56 }
 0x298   :  { %677 = vmatpush.msrb.mxu2 %v648_v57 }
 0x299   :  { %748 = vmatmul.msk.f32.vlgmr.msrb.gmra.mxu2 %vm432_vm5, %v652_v58 }
 0x31c   :  { %v679_v60 = vpop.f32.mrf.mxu2 }
 0x31d   :  { %v680_v61 = vadd.f32 %v679_v60, %v657_v59 }
 0x31f   :  { %774 = vtanh.f32 %v680_v61 }
 0x325   :  { %v775_v62 = vpop.eup %774 }
 0x326   :  { %683 = vst [vmem:[#allocation2] sm:$0xff] %v775_v62 }
 0x327   :  { %694 = dma.vmem_to_hbm [thread:$0]  %s690_s4, 128, %s692_s30, [#allocation3]  }
 0x328   :  { %800 = dma.done.wait [#allocation3], 128  }
 0x329   :  { %801 = vsyncadd [#allocation3], 4294967168 }
 0x32a   :  { %699 = vsyncpa [#allocation3], 1 }

</bundles_post_ra>
